<compile_context>
chip_gen: v7x
topology: tpu7x:2x2x1
jax: 0.10.0
libtpu: 0.0.40
codegen_flags: <defaults>
</compile_context>

<pallas_src>
import functools

import jax
import jax.numpy as jnp
from jax.experimental import pallas as pl
from jax.experimental.pallas import tpu as pltpu


def _focal_loss_kernel(logits_ref, target_ref, alpha_ref, sum_ref, cnt_ref, *,
                       gamma, eps, ignore_label, hw, tiles_per_shard, tile_p):
    """One grid step handles a (1, C, TILE_P) block: TILE_P pixels, all classes."""
    s = pl.program_id(0)   # shard (parallel)
    b = pl.program_id(1)   # batch  (arbitrary, reduced)
    p = pl.program_id(2)   # pixel tile within shard (arbitrary, reduced)

    @pl.when(jnp.logical_and(b == 0, p == 0))
    def _init():
        sum_ref[...] = jnp.zeros_like(sum_ref)
        cnt_ref[...] = jnp.zeros_like(cnt_ref)

    x = logits_ref[...].astype(jnp.float32)          # (1, C, T)  cast after DMA
    t = target_ref[...]                              # (1, 1, T)  int32

    # --- softmax at the target class via log-sum-exp over the class (sublane) axis
    m = jnp.max(x, axis=1, keepdims=True)            # (1, 1, T)
    xs = x - m
    lse = jnp.log(jnp.sum(jnp.exp(xs), axis=1, keepdims=True))   # (1, 1, T)

    cls = jax.lax.broadcasted_iota(jnp.int32, x.shape, 1)        # (1, C, T)
    onehot = (cls == t).astype(jnp.float32)                      # (1, C, T)
    x_t = jnp.sum(xs * onehot, axis=1, keepdims=True)            # (1, 1, T)
    alpha_c = jnp.sum(alpha_ref[...] * onehot, axis=1, keepdims=True)

    pt = jnp.exp(x_t - lse) + eps                    # prob at target + eps
    logpt = alpha_c * jnp.log(pt)

    # focal term: avoid float pow (exp+log on the single EUP slot) for int gamma
    omp = 1.0 - pt
    if float(gamma) == 2.0:
        focal = omp * omp
    elif float(gamma).is_integer() and gamma >= 0:
        focal = jnp.ones_like(omp)
        for _ in range(int(gamma)):
            focal = focal * omp
    else:
        focal = jnp.power(omp, gamma)

    loss = -(focal * logpt)                          # (1, 1, T)

    # --- validity mask: in-range pixel (handles ragged last tile + clamped
    #     duplicate tiles of the shard split) AND target not ignored.
    tile_idx = s * tiles_per_shard + p               # UNclamped global tile idx
    pix = tile_idx * tile_p + jax.lax.broadcasted_iota(jnp.int32, t.shape, 2)
    valid = jnp.logical_and(pix < hw,
                            jnp.logical_and(t >= 0, t != ignore_label))

    # lane-dense accumulation; jnp.where keeps OOB garbage / NaNs out
    sum_ref[...] += jnp.where(valid, loss, 0.0)
    cnt_ref[...] += valid.astype(jnp.float32)


def focal_loss(logits, target, *, num_class, alpha=0.25, gamma=2.0,
               balance_index=2, size_average=True, ignore_label=255,
               eps=1e-6, tile_p=4096, num_shards=2):
    """logits: (N, C, H, W); target: (N, H, W) int."""
    n, c, h, w = logits.shape
    assert c == num_class
    hw = h * w

    # deterministic alpha vector, exactly as the module's __init__ (scalar path)
    alpha_vec = jnp.full((num_class,), 1.0 - float(alpha), dtype=jnp.float32)
    alpha_vec = alpha_vec.at[balance_index].set(float(alpha))
    alpha_vec = alpha_vec.reshape(1, num_class, 1)

    # zero-copy reshapes: pixels -> lane axis, classes -> sublane axis
    x = logits.reshape(n, c, hw)                       # keep native dtype
    t = target.reshape(n, 1, hw).astype(jnp.int32)

    # lane tile: multiple of 128, capped by the (128-padded) pixel count and by
    # a conservative VMEM budget (double-buffered logits+targets + resident outs)
    hw_pad = ((hw + 127) // 128) * 128
    itemsize = jnp.dtype(logits.dtype).itemsize
    per_pix_bytes = 2 * (c * itemsize + 4) + 2 * 4
    vmem_cap = max(128, ((16 * 1024 * 1024) // per_pix_bytes) // 128 * 128)
    tp = max(128, (min(int(tile_p), hw_pad, vmem_cap) // 128) * 128)

    num_p_tiles = (hw + tp - 1) // tp
    shards = max(1, min(int(num_shards), num_p_tiles))   # 2 uses both v7x TCs
    tps = (num_p_tiles + shards - 1) // shards
    last_tile = num_p_tiles - 1

    grid = (shards, n, tps)

    kern = functools.partial(
        _focal_loss_kernel, gamma=float(gamma), eps=float(eps),
        ignore_label=int(ignore_label), hw=hw, tiles_per_shard=tps, tile_p=tp)

    def data_map(s, b, p):
        # clamp so the (possibly empty) overflow tiles of the last shard read a
        # valid block; the kernel masks them out via the pixel-index check.
        return (b, 0, jnp.minimum(s * tps + p, last_tile))

    sum_out, cnt_out = pl.pallas_call(
        kern,
        out_shape=(jax.ShapeDtypeStruct((shards, 1, tp), jnp.float32),
                   jax.ShapeDtypeStruct((shards, 1, tp), jnp.float32)),
        grid_spec=pltpu.PrefetchScalarGridSpec(
            num_scalar_prefetch=0,
            grid=grid,
            in_specs=[
                pl.BlockSpec((1, c, tp), data_map),              # logits tile
                pl.BlockSpec((1, 1, tp), data_map),              # target tile
                pl.BlockSpec((1, num_class, 1), lambda s, b, p: (0, 0, 0)),
            ],
            out_specs=(pl.BlockSpec((1, 1, tp), lambda s, b, p: (s, 0, 0)),
                       pl.BlockSpec((1, 1, tp), lambda s, b, p: (s, 0, 0))),
        ),
        compiler_params=pltpu.CompilerParams(
            dimension_semantics=("parallel", "arbitrary", "arbitrary")),
    )(x, t, alpha_vec)

    # tiny final reduction (over shards and lanes) in plain JAX
    loss_sum = jnp.sum(sum_out)
    cnt = jnp.sum(cnt_out)
    return loss_sum / cnt if size_average else loss_sum


def _focal_loss_ref(logits, target, *, num_class, alpha=0.25, gamma=2.0,
                    balance_index=2, size_average=True, ignore_label=255,
                    eps=1e-6):
    """Pure-JAX reference mirroring the PyTorch forward."""
    alpha_vec = jnp.full((num_class,), 1.0 - alpha, dtype=jnp.float32)
    alpha_vec = alpha_vec.at[balance_index].set(alpha)

    prob = jax.nn.softmax(logits.astype(jnp.float32), axis=1)
    prob = jnp.transpose(prob, (0, 2, 3, 1)).reshape(-1, num_class)
    t = target.reshape(-1).astype(jnp.int32)
    valid = (t >= 0) & (t != ignore_label)
    t_safe = jnp.where(valid, t, 0)

    pt = jnp.take_along_axis(prob, t_safe[:, None], axis=1)[:, 0] + eps
    logpt = jnp.log(pt)
    logpt = alpha_vec[t_safe] * logpt
    loss = -jnp.power(1.0 - pt, gamma) * logpt
    loss = jnp.where(valid, loss, 0.0)
    if size_average:
        return jnp.sum(loss) / jnp.sum(valid.astype(jnp.float32))
    return jnp.sum(loss)


if __name__ == "__main__":
    NUM_CLASS = 4
    N, C, H, W = 2, NUM_CLASS, 16, 16
    IGNORE = 255

    key = jax.random.PRNGKey(0)
    k_logit, k_tgt, k_ign = jax.random.split(key, 3)

    logits = jax.random.normal(k_logit, (N, C, H, W), dtype=jnp.float32)
    target = jax.random.randint(k_tgt, (N, H, W), 0, NUM_CLASS, dtype=jnp.int32)
    # sprinkle some ignore_label pixels to exercise the masking path
    ignore_mask = jax.random.bernoulli(k_ign, 0.1, (N, H, W))
    target = jnp.where(ignore_mask, IGNORE, target)

    loss = focal_loss(logits, target, num_class=NUM_CLASS, alpha=0.25,
                      gamma=2.0, balance_index=2, size_average=True,
                      ignore_label=IGNORE)
    loss = jax.block_until_ready(loss)

    ref = _focal_loss_ref(logits, target, num_class=NUM_CLASS, alpha=0.25,
                          gamma=2.0, balance_index=2, size_average=True,
                          ignore_label=IGNORE)
    assert jnp.allclose(loss, ref, rtol=1e-5, atol=1e-6), (loss, ref)

    print("KERNEL_OK")
</pallas_src>

<mosaic_0001>
module attributes {stable_mosaic.version = 11 : i64} {
  func.func @_focal_loss_kernel(%arg0: i32, %arg1: i32, %arg2: i32, %arg3: memref<1x4x256xf32, #tpu.memory_space<vmem>>, %arg4: memref<1x1x256xi32, #tpu.memory_space<vmem>>, %arg5: memref<1x4x1xf32, #tpu.memory_space<vmem>>, %arg6: memref<1x1x256xf32, #tpu.memory_space<vmem>>, %arg7: memref<1x1x256xf32, #tpu.memory_space<vmem>>) attributes {dimension_semantics = [#tpu.dimension_semantics<parallel>, #tpu.dimension_semantics<arbitrary>, #tpu.dimension_semantics<arbitrary>], iteration_bounds = array<i64: 1, 2, 1>, scalar_prefetch = 0 : i64, scratch_operands = 0 : i64, tpu.core_type = #tpu.core_type<tc>, window_params = [{transform_indices = @transform_0, window_bounds = array<i64: 1, 4, 256>}, {transform_indices = @transform_1, window_bounds = array<i64: 1, 1, 256>}, {pipeline_mode = #tpu.pipeline_mode<synchronous>, transform_indices = @transform_2, window_bounds = array<i64: 1, 4, 1>}, {transform_indices = @transform_3, window_bounds = array<i64: 1, 1, 256>}, {transform_indices = @transform_4, window_bounds = array<i64: 1, 1, 256>}]} {
    %c0_i32 = arith.constant 0 : i32
    %0 = arith.cmpi eq, %arg1, %c0_i32 : i32
    %c0_i32_0 = arith.constant 0 : i32
    %1 = arith.cmpi eq, %arg2, %c0_i32_0 : i32
    %2 = arith.andi %0, %1 : i1
    %3 = arith.extui %2 : i1 to i32
    %c0_i32_1 = arith.constant 0 : i32
    %4 = arith.cmpi ne, %3, %c0_i32_1 : i32
    scf.if %4 {
      %cst_31 = arith.constant 0.000000e+00 : f32
      %64 = vector.broadcast %cst_31 : f32 to vector<1x1x256xf32>
      %c0_32 = arith.constant 0 : index
      %c0_33 = arith.constant 0 : index
      %c0_34 = arith.constant 0 : index
      %65 = vector.load %arg6[%c0_32, %c0_33, %c0_34] : memref<1x1x256xf32, #tpu.memory_space<vmem>>, vector<1x1x256xf32>
      tpu.vector_store %arg6[%c0_32, %c0_33, %c0_34], %64 {strides = array<i32>} : memref<1x1x256xf32, #tpu.memory_space<vmem>>, vector<1x1x256xf32>,
      %cst_35 = arith.constant 0.000000e+00 : f32
      %66 = vector.broadcast %cst_35 : f32 to vector<1x1x256xf32>
      %c0_36 = arith.constant 0 : index
      %c0_37 = arith.constant 0 : index
      %c0_38 = arith.constant 0 : index
      %67 = vector.load %arg7[%c0_36, %c0_37, %c0_38] : memref<1x1x256xf32, #tpu.memory_space<vmem>>, vector<1x1x256xf32>
      tpu.vector_store %arg7[%c0_36, %c0_37, %c0_38], %66 {strides = array<i32>} : memref<1x1x256xf32, #tpu.memory_space<vmem>>, vector<1x1x256xf32>,
    } else {
    }
    %c0 = arith.constant 0 : index
    %c0_2 = arith.constant 0 : index
    %c0_3 = arith.constant 0 : index
    %5 = vector.load %arg3[%c0, %c0_2, %c0_3] : memref<1x4x256xf32, #tpu.memory_space<vmem>>, vector<1x4x256xf32>
    %c0_4 = arith.constant 0 : index
    %c0_5 = arith.constant 0 : index
    %c0_6 = arith.constant 0 : index
    %6 = vector.load %arg4[%c0_4, %c0_5, %c0_6] : memref<1x1x256xi32, #tpu.memory_space<vmem>>, vector<1x1x256xi32>
    %cst = arith.constant dense<0xFF800000> : vector<1x256xf32>
    %7 = vector.multi_reduction <maximumf>, %5, %cst [1] : vector<1x4x256xf32> to vector<1x256xf32>
    %8 = vector.shape_cast %7 : vector<1x256xf32> to vector<1x1x256xf32>
    %9 = vector.broadcast %8 : vector<1x1x256xf32> to vector<1x4x256xf32>
    %10 = arith.subf %5, %9 : vector<1x4x256xf32>
    %11 = math.exp %10 : vector<1x4x256xf32>
    %cst_7 = arith.constant dense<0.000000e+00> : vector<1x256xf32>
    %12 = vector.multi_reduction <add>, %11, %cst_7 [1] : vector<1x4x256xf32> to vector<1x256xf32>
    %13 = vector.shape_cast %12 : vector<1x256xf32> to vector<1x1x256xf32>
    %14 = math.log %13 : vector<1x1x256xf32>
    %15 = tpu.iota {dimensions = array<i32: 1>} : vector<1x4x256xi32>
    %16 = vector.broadcast %6 : vector<1x1x256xi32> to vector<1x4x256xi32>
    %17 = arith.cmpi eq, %15, %16 : vector<1x4x256xi32>
    %18 = arith.extui %17 : vector<1x4x256xi1> to vector<1x4x256xi32>
    %19 = arith.sitofp %18 : vector<1x4x256xi32> to vector<1x4x256xf32>
    %20 = arith.mulf %10, %19 : vector<1x4x256xf32>
    %cst_8 = arith.constant dense<0.000000e+00> : vector<1x256xf32>
    %21 = vector.multi_reduction <add>, %20, %cst_8 [1] : vector<1x4x256xf32> to vector<1x256xf32>
    %22 = vector.shape_cast %21 : vector<1x256xf32> to vector<1x1x256xf32>
    %c0_9 = arith.constant 0 : index
    %c0_10 = arith.constant 0 : index
    %c0_11 = arith.constant 0 : index
    %23 = vector.load %arg5[%c0_9, %c0_10, %c0_11] : memref<1x4x1xf32, #tpu.memory_space<vmem>>, vector<1x4x1xf32>
    %24 = vector.broadcast %23 : vector<1x4x1xf32> to vector<1x4x256xf32>
    %25 = arith.mulf %24, %19 : vector<1x4x256xf32>
    %cst_12 = arith.constant dense<0.000000e+00> : vector<1x256xf32>
    %26 = vector.multi_reduction <add>, %25, %cst_12 [1] : vector<1x4x256xf32> to vector<1x256xf32>
    %27 = vector.shape_cast %26 : vector<1x256xf32> to vector<1x1x256xf32>
    %28 = arith.subf %22, %14 : vector<1x1x256xf32>
    %29 = math.exp %28 : vector<1x1x256xf32>
    %cst_13 = arith.constant 9.99999997E-7 : f32
    %30 = vector.broadcast %cst_13 : f32 to vector<1x1x256xf32>
    %31 = arith.addf %29, %30 : vector<1x1x256xf32>
    %32 = math.log %31 : vector<1x1x256xf32>
    %33 = arith.mulf %27, %32 : vector<1x1x256xf32>
    %cst_14 = arith.constant 1.000000e+00 : f32
    %34 = vector.broadcast %cst_14 : f32 to vector<1x1x256xf32>
    %35 = arith.subf %34, %31 : vector<1x1x256xf32>
    %36 = arith.mulf %35, %35 : vector<1x1x256xf32>
    %37 = arith.mulf %36, %33 : vector<1x1x256xf32>
    %cst_15 = arith.constant 0.000000e+00 : f32
    %38 = vector.broadcast %cst_15 : f32 to vector<1x1x256xf32>
    %39 = arith.subf %38, %37 : vector<1x1x256xf32>
    %c1_i32 = arith.constant 1 : i32
    %40 = arith.muli %arg0, %c1_i32 : i32
    %41 = arith.addi %40, %arg2 : i32
    %c256_i32 = arith.constant 256 : i32
    %42 = arith.muli %41, %c256_i32 : i32
    %43 = tpu.iota {dimensions = array<i32: 2>} : vector<1x1x256xi32>
    %44 = vector.broadcast %42 : i32 to vector<1x1x256xi32>
    %45 = arith.addi %44, %43 : vector<1x1x256xi32>
    %c256_i32_16 = arith.constant 256 : i32
    %46 = vector.broadcast %c256_i32_16 : i32 to vector<1x1x256xi32>
    %47 = arith.cmpi slt, %45, %46 : vector<1x1x256xi32>
    %c0_i32_17 = arith.constant 0 : i32
    %48 = vector.broadcast %c0_i32_17 : i32 to vector<1x1x256xi32>
    %49 = arith.cmpi sge, %6, %48 : vector<1x1x256xi32>
    %c255_i32 = arith.constant 255 : i32
    %50 = vector.broadcast %c255_i32 : i32 to vector<1x1x256xi32>
    %51 = arith.cmpi ne, %6, %50 : vector<1x1x256xi32>
    %52 = arith.andi %49, %51 : vector<1x1x256xi1>
    %53 = arith.andi %47, %52 : vector<1x1x256xi1>
    %c0_18 = arith.constant 0 : index
    %c0_19 = arith.constant 0 : index
    %c0_20 = arith.constant 0 : index
    %54 = vector.load %arg6[%c0_18, %c0_19, %c0_20] : memref<1x1x256xf32, #tpu.memory_space<vmem>>, vector<1x1x256xf32>
    %cst_21 = arith.constant 0.000000e+00 : f32
    %55 = vector.broadcast %cst_21 : f32 to vector<1x1x256xf32>
    %56 = arith.select %53, %39, %55 : vector<1x1x256xi1>, vector<1x1x256xf32>
    %57 = arith.addf %54, %56 : vector<1x1x256xf32>
    %c0_22 = arith.constant 0 : index
    %c0_23 = arith.constant 0 : index
    %c0_24 = arith.constant 0 : index
    %58 = vector.load %arg6[%c0_22, %c0_23, %c0_24] : memref<1x1x256xf32, #tpu.memory_space<vmem>>, vector<1x1x256xf32>
    tpu.vector_store %arg6[%c0_22, %c0_23, %c0_24], %57 {strides = array<i32>} : memref<1x1x256xf32, #tpu.memory_space<vmem>>, vector<1x1x256xf32>,
    %c0_25 = arith.constant 0 : index
    %c0_26 = arith.constant 0 : index
    %c0_27 = arith.constant 0 : index
    %59 = vector.load %arg7[%c0_25, %c0_26, %c0_27] : memref<1x1x256xf32, #tpu.memory_space<vmem>>, vector<1x1x256xf32>
    %60 = arith.extui %53 : vector<1x1x256xi1> to vector<1x1x256xi32>
    %61 = arith.sitofp %60 : vector<1x1x256xi32> to vector<1x1x256xf32>
    %62 = arith.addf %59, %61 : vector<1x1x256xf32>
    %c0_28 = arith.constant 0 : index
    %c0_29 = arith.constant 0 : index
    %c0_30 = arith.constant 0 : index
    %63 = vector.load %arg7[%c0_28, %c0_29, %c0_30] : memref<1x1x256xf32, #tpu.memory_space<vmem>>, vector<1x1x256xf32>
    tpu.vector_store %arg7[%c0_28, %c0_29, %c0_30], %62 {strides = array<i32>} : memref<1x1x256xf32, #tpu.memory_space<vmem>>, vector<1x1x256xf32>,
    return
  }
  func.func @transform_0(%arg0: i32, %arg1: i32, %arg2: i32) -> (i32, i32, i32) {
    %c1_i32 = arith.constant 1 : i32
    %0 = arith.muli %arg0, %c1_i32 : i32
    %1 = arith.addi %0, %arg2 : i32
    %c0_i32 = arith.constant 0 : i32
    %2 = arith.minsi %1, %c0_i32 : i32
    %c0_i32_0 = arith.constant 0 : i32
    %c0_i32_1 = arith.constant 0 : i32
    return %arg1, %c0_i32_0, %2 : i32, i32, i32
  }
  func.func @transform_1(%arg0: i32, %arg1: i32, %arg2: i32) -> (i32, i32, i32) {
    %c1_i32 = arith.constant 1 : i32
    %0 = arith.muli %arg0, %c1_i32 : i32
    %1 = arith.addi %0, %arg2 : i32
    %c0_i32 = arith.constant 0 : i32
    %2 = arith.minsi %1, %c0_i32 : i32
    %c0_i32_0 = arith.constant 0 : i32
    %c0_i32_1 = arith.constant 0 : i32
    return %arg1, %c0_i32_0, %2 : i32, i32, i32
  }
  func.func @transform_2(%arg0: i32, %arg1: i32, %arg2: i32) -> (i32, i32, i32) {
    %c0_i32 = arith.constant 0 : i32
    %c0_i32_0 = arith.constant 0 : i32
    %c0_i32_1 = arith.constant 0 : i32
    %c0_i32_2 = arith.constant 0 : i32
    return %c0_i32, %c0_i32_0, %c0_i32_1 : i32, i32, i32
  }
  func.func @transform_3(%arg0: i32, %arg1: i32, %arg2: i32) -> (i32, i32, i32) {
    %c0_i32 = arith.constant 0 : i32
    %c0_i32_0 = arith.constant 0 : i32
    %c0_i32_1 = arith.constant 0 : i32
    return %arg0, %c0_i32, %c0_i32_0 : i32, i32, i32
  }
  func.func @transform_4(%arg0: i32, %arg1: i32, %arg2: i32) -> (i32, i32, i32) {
    %c0_i32 = arith.constant 0 : i32
    %c0_i32_0 = arith.constant 0 : i32
    %c0_i32_1 = arith.constant 0 : i32
    return %arg0, %c0_i32, %c0_i32_0 : i32, i32, i32
  }
}

</mosaic_0001>

<bundles_post_ra>
// kernel: tpu_custom_call.1
= control target key start
LH: loop header
LB: loop body
LE: loop exit
PB: predicated region body
PF: predicated region fallthrough
CT: control target
= control target key end

     0   :  { %10 = vsyncpa [#allocation3], 0  ;;  %s1150_s0 = inlined_call_operand.hbm [shape: f32[2,4,256], index: 0, kind: input, shape index: {}]   ;;  %s1151_s1 = inlined_call_operand.vmem [shape: s32[2,1,256], index: 1, kind: input, shape index: {}]   ;;  %s1152_s2 = inlined_call_operand.vmem [shape: f32[1,4,1], index: 2, kind: input, shape index: {}]   ;;  %s1153_s3 = inlined_call_operand.hbm [shape: f32[1,1,256], index: 3, kind: output, shape index: {0}]   ;;  %s1154_s4 = inlined_call_operand.hbm [shape: f32[1,1,256], index: 4, kind: output, shape index: {1}]  }
   0x1   :  { %12 = vsyncpa [#allocation3 + $0x1], 0 }
   0x2   :  { %13 = vsyncpa [#allocation4], 0 }
   0x3   :  { %14 = vsyncpa [#allocation7], 0  ;;  %s925_s15 = smov 0   ;;  %s927_s16 = smov 0  }
   0x4   :  { %s929_s17 = smov 0   ;;  %s931_s18 = smov 0  }
   0x5   :  { %s933_s19 = smov 0   ;;  %s935_s20 = smov 0  }
   0x6 LB: > { %s640_s21 = sadd.s32 4294967295, %s891_s20   ;;  %s35_s22 = sadd.s32 1, %s887_s19  ;;  %s891_s20 = sphi %s935_s20, %s20_s20   ;;  %s887_s19 = sphi %s933_s19, %s1167_s19   ;;  %s883_s18 = sphi %s931_s18, %s1166_s18   ;;  %s879_s17 = sphi %s929_s17, %s1165_s17   ;;  %s875_s16 = sphi %s927_s16, %s1164_s16   ;;  %s871_s15 = sphi %s925_s15, %s1163_s15  }
   0x7   : > { %p37_p0 = scmp.ge.s32.totalorder %s35_s22, 2  ;;  %s54_s23 = sadd.s32 1, %s879_s17 }
   0x8   : > { %p61_p1 = scmp.ne.s32.totalorder %s879_s17, %s875_s16  ;;  %p62_p2 = scmp.eq.s32.totalorder %s891_s20, 0 }
   0x9   : > { %s1169_s22 = smov (%p37_p0, %s35_s22), 0  ;;  %p67_p4 = scmp.ne.s32.totalorder %s875_s16, %s871_s15 }
   0xa   : > { %p961_p3 = por %p62_p2, %p61_p1  ;;  %s49_s25 = ssub.s32 %s887_s19, %s1169_s22 }
   0xb   : > { %p68_p5 = scmp.eq.s32.totalorder %s640_s21, 0  ;;  %p52_p6 = scmp.eq.s32.totalorder %s49_s25, 0 }
   0xc   : > { %p676_p8 = scmp.lt.s32.totalorder %s891_s20, 2  ;;  %s201_s28 = sand.u32 1, %s879_s17  }
   0xd   : > { %p970_p7 = por %p68_p5, %p67_p4  ;;  %s660_s29 = sshll.u32 %s887_s19, 7 }
   0xe   : > { %s976_s27 = scalar_select %p52_p6, %s879_s17, %s54_s23  }
   0xf   : > { %s643_s30 = sshll.u32 %s201_s28, 3  ;;  %s983_s7 = scalar_lea.hbm %s1150_s0, %s660_s29 }
  0x10   : > { %s205_s8 = scalar_lea.vmem [#allocation2], %s643_s30  ;;  %p987_p9 = pnand %p676_p8, %p961_p3 }
  0x11   : > { %s218_s9 = sshll.u32 %s205_s8, 4  ;;  %s202_s11 = scalar_lea.sflag [#allocation3], %s201_s28  ;;  %s991_s9 = int_to_ptr.vmem [resolvable:$true] %s218_s9 }
  0x12   : > { %s751_s12 = scalar_lea.hbm %s983_s7, 128  ;;  %p753_p13 = pneg %p987_p9 }
  0x13   : > { %p752_p12 = scmp.ne.s32.totalorder %s983_s7, %s751_s12  ;;  %s756_s15 = scalar_lea.hbm %s1150_s0, 256 }
  0x14   : > { %p757_p2 = scmp.lt.u32.totalorder %s983_s7, %s1150_s0  ;;  %p758_p3 = scmp.lt.u32.totalorder %s756_s15, %s751_s12 }
  0x15   : > { %p754_p0 = pnand %p753_p13, %p752_p12  ;;  %p760_p5 = scmp.lt.u32.totalorder %s751_s12, %s983_s7 }
  0x16   : > { %p759_p4 = por %p758_p3, %p757_p2 }
  0x17   : > { %p755_p1 = pneg %p754_p0 }
  0x18   : > { %p761_p6 = por %p760_p5, %p759_p4 }
  0x1a   : > { %p762_p8 = pnand %p761_p6, %p755_p1 }
  0x1c   : > { %765 = shalt.err (!%p762_p8)
}
  0x1d   : > { %s766_s25 = scalar_lea.vmem %s991_s9, 128  ;;  %s893_s28 = smov [#allocation2]  }
  0x1e   : > { %p767_p12 = scmp.ne.s32.totalorder %s991_s9, %s766_s25  ;;  %s771_s29 = sshll.u32 %s893_s28, 4  ;;  %s772_s29 = int_to_ptr.vmem [resolvable:$false] %s771_s29 }
  0x1f   : > { %s773_s30 = scalar_lea.vmem %s772_s29, 256  ;;  %p774_p11 = scmp.lt.s32.totalorder %s991_s9, %s772_s29 }
  0x20   : > { %p769_p0 = pnand %p767_p12, %p753_p13  ;;  %p775_p2 = scmp.lt.s32.totalorder %s773_s30, %s766_s25 }
  0x22   : > { %p770_p10 = pneg %p769_p0  ;;  %p776_p3 = por %p775_p2, %p774_p11 }
  0x24   : > { %p777_p4 = pnand %p776_p3, %p770_p10 }
  0x26   : > { %780 = shalt.err (!%p777_p4)
}
  0x27   : > { %675 = dma.hbm_to_vmem [thread:$0]  (!%p987_p9), %s983_s7, 128, %s991_s9, %s202_s11  }
  0x28   : > { %p1158_p1 = scmp.lt.s32.totalorder %s891_s20, 3  ;;  %p1159_p5 = scmp.ge.s32.totalorder %s891_s20, 1 }
  0x2a   : > { %p242_p13 = pnand %p1159_p5, %p1158_p1 }
  0x2b   : > { %s247_s5 = sand.u32 (!%p242_p13), 1, %s875_s16  }
  0x2c   : > { %245 = sbr.rel (%p242_p13) target bundleno = 238 (0xee), region = 32  ;;  %s647_s6 = sshll.u32 (!%p242_p13), %s247_s5, 3 }
  0x2d   : > { %s248_s8 = scalar_lea.sflag (!%p242_p13), [#allocation3], %s247_s5  ;;  %s251_s12 = scalar_lea.vmem (!%p242_p13), [#allocation2], %s647_s6 }
  0x33   : > { %858 = dma.done.wait (%p970_p7), %s248_s8, 128  }
  0x34   : > { %860 = vsyncadd (%p970_p7), %s248_s8, 4294967168  ;;  %p290_p10 = scmp.lt.s32.totalorder %s883_s18, 1  ;;  %p301_p9 = scmp.eq.s32.totalorder %s883_s18, 0 }
  0x35   : > { %v307_v0 = vlaneseq (%p301_p9)  ;;  %v894_v1 = vmov (%p301_p9), 0.0  }
  0x36   : > { %s1171_s18 = smov (!%p290_p10, %s883_s18), 1  ;;  %306 = sbr.rel (!%p301_p9) target bundleno = 61 (0x3d), region = 40 }
  0x37   : > { %s648_s7 = sshll.u32 %s1171_s18, 1  ;;  %vm309_vm0 = vcmp.lt.s32.totalorder (%p301_p9), %v307_v0, 256 }
  0x38   : > { %s296_s11 = scalar_lea.vmem %s1151_s1, %s648_s7  ;;  %311 = vst.msk [vmem:[#allocation5] sm:$0x3] (%p301_p9), %vm309_vm0, %v894_v1  ;;  %312 = vst.msk [vmem:[#allocation6] sm:$0x3] (%p301_p9), %vm309_vm0, %v894_v1 }
  0x3d PF: > { %v314_v2 = vld [vmem:[%s296_s11] sm:$0x3]  ;;  %v361_v3 = vlaneseq  ;;  %v895_v4 = vmov 0   ;;  %vm318_vm3 = vcmask 1043456   ;;  %v896_v22 = vmov 0.0   ;;  %p1066_p7 = scmp.eq.s32.totalorder %s640_s21, 1 }
  0x3e   : > { %735 = vset.pattern.permute.xlu0 %v895_v4  ;;  %vm453_vm1 = vcmp.ge.s32.totalorder %v314_v2, 0  ;;  %vm454_vm2 = vcmp.ne.s32.totalorder %v314_v2, 255  ;;  %v399_v5 = vld [vmem:[%s1152_s2] sm:$0xf]  ;;  %v897_v26 = vmov 1966171168  }
  0x3f   : > { %v313_v6 = vld [vmem:[%s251_s12] sm:$0xff]  ;;  %v362_v7 = vshrl.u32 %v361_v3, 7  ;;  %402 = vperm.xlu0 %735, %v399_v5   ;;  %vm455_vm4 = vmand %vm453_vm1, %vm454_vm2  ;;  %v476_v27 = vunpack.c.l.s4 %v897_v26  ;;  %v496_v43 = vld [vmem:[#allocation6] sm:$0x3]  ;;  %vm1060_vm9 = vcmp.lt.s32.totalorder %v361_v3, 256  ;;  %s898_s14 = smov [#allocation6]  }
  0x40   : > { %v316_v8 = vcombine.high %v313_v6, %v313_v6  ;;  %v319_v9 = vsel %vm318_vm3, %v313_v6, -inf  ;;  %v456_v14 = vsel %vm455_vm4, 1, %v895_v4  ;;  %s545_s15 = sshll.u32 %s898_s14, 4  ;;  %s546_s15 = int_to_ptr.vmem [resolvable:$true] %s545_s15 }
  0x41   : > { %v365_v10 = vsub.s32 0, %v362_v7  ;;  %v369_v11 = vsub.s32 1, %v362_v7  ;;  %v320_v13 = vrot.slane %v319_v9, 4  ;;  %v477_v30 = vunpack.c.0.s8 %v476_v27  ;;  %s781_s23 = scalar_lea.vmem %s546_s15, 32  ;;  %p788_p12 = scmp.lt.s32.totalorder %s546_s15, %s546_s15 }
  0x42   : > { %v326_v12 = vsel %vm318_vm3, %v316_v8, -inf  ;;  %p782_p11 = scmp.ne.s32.totalorder %s546_s15, %s781_s23  ;;  %p789_p0 = scmp.lt.s32.totalorder %s781_s23, %s781_s23 }
  0x43   : > { %v327_v15 = vrot.slane %v326_v12, 4  ;;  %v366_v16 = vrot.slane %v314_v2, %v365_v10  ;;  %v370_v17 = vrot.slane %v314_v2, %v369_v11  ;;  %v1040_v18 = vrot.slane %v456_v14, %v365_v10 }
  0x44   : > { %v321_v19 = vmax.f32 %v319_v9, %v320_v13  ;;  %v1042_v20 = vrot.slane %v456_v14, %v369_v11  ;;  %v1056_v35 = vsub.s32 %v477_v30, %v362_v7  ;;  %p783_p6 = pnand %p782_p11, %p1066_p7  ;;  %p790_p2 = por %p789_p0, %p788_p12 }
  0x45   : > { %vm371_vm5 = vcmp.eq.s32.totalorder %v362_v7, %v366_v16  ;;  %vm372_vm6 = vcmp.eq.s32.totalorder %v362_v7, %v370_v17  ;;  %v328_v21 = vmax.f32 %v326_v12, %v327_v15  ;;  %vm465_vm7 = vcmp.ne.s32.totalorder %v1040_v18, 0 }
  0x46   : > { %v1044_v23 = vsel %vm371_vm5, 1.0, %v896_v22  ;;  %v1046_v24 = vsel %vm372_vm6, 1.0, %v896_v22  ;;  %vm466_vm8 = vcmp.ne.s32.totalorder %v1042_v20, 0  ;;  %v322_v28 = vrot.slane %v321_v19, 2  ;;  %p784_p8 = pneg %p783_p6 }
  0x47   : > { %v379_v25 = vcombine.low %v1044_v23, %v1046_v24  ;;  %v329_v29 = vrot.slane %v328_v21, 2  ;;  %v652_v31 = vsel %vm465_vm7, 1.0, %v896_v22  ;;  %v653_v32 = vsel %vm466_vm8, 1.0, %v896_v22 }
  0x48   : > { %v323_v33 = vmax.f32 %v321_v19, %v322_v28  ;;  %v503_v36 = vcombine.low %v652_v31, %v653_v32  ;;  %p791_p3 = pnand %p790_p2, %p784_p8 }
  0x49   : > { %v330_v34 = vmax.f32 %v328_v21, %v329_v29 }
  0x4a   : > { %v324_v37 = vrot.slane %v323_v33, 1  ;;  %v510_v39 = vrot.slane %v503_v36, %v1056_v35 }
  0x4b   : > { %v331_v38 = vrot.slane %v330_v34, 1 }
  0x4c   : > { %v325_v40 = vmax.f32 %v323_v33, %v324_v37  ;;  %v517_v42 = vrot.slane %v510_v39, %v1056_v35 }
  0x4d   : > { %v332_v41 = vmax.f32 %v330_v34, %v331_v38 }
  0x4e   : > { %v519_v46 = vadd.f32 %v517_v42, %v496_v43 }
  0x4f   : > { %v335_v44 = vcombine.low %v325_v40, %v332_v41 }
  0x50   : > { %520 = vst.msk [vmem:[#allocation6] sm:$0x3] %vm1060_vm9, %v519_v46 }
  0x51   : > { %v337_v47 = vsub.f32 %v313_v6, %v335_v44 }
  0x52   : > { %794 = shalt.err (!%p791_p3)
}
  0x53   : > { %s795_s25 = scalar_lea.hbm %s1154_s4, 32 }
  0x54   : > { %p796_p4 = scmp.ne.s32.totalorder %s1154_s4, %s795_s25  ;;  %p801_p13 = scmp.lt.u32.totalorder %s795_s25, %s1154_s4 }
  0x56   : > { %p797_p1 = pnand %p796_p4, %p1066_p7 }
  0x58   : > { %p798_p5 = pneg %p797_p1 }
  0x5a   : > { %p803_p10 = pnand %p801_p13, %p798_p5 }
  0x5c   : > { %806 = shalt.err (!%p803_p10)
}
  0x5d   : > { %667 = dma.vmem_to_hbm [thread:$0]  (%p1066_p7), %s546_s15, 32, %s1154_s4, [#allocation7]   ;;  %v338_v48 = vmul.f32 1.442695, %v337_v47  ;;  %v381_v57 = vmul.f32 %v379_v25, %v337_v47 }
  0x5e   : > { %s899_s12 = smov [#allocation5]  }
  0x5f   : > { %737 = vpow2.f32 %v338_v48  ;;  %v383_v60 = vcombine.high %v381_v57, %v381_v57  ;;  %v385_v63 = vsel %vm318_vm3, %v381_v57, 0.0  ;;  %s531_s7 = sshll.u32 %s899_s12, 4  ;;  %s532_s7 = int_to_ptr.vmem [resolvable:$true] %s531_s7 }
  0x60   : > { %v386_v3 = vrot.slane %v385_v63, 4  ;;  %s807_s9 = scalar_lea.vmem %s532_s7, 32  ;;  %p814_p8 = scmp.lt.s32.totalorder %s532_s7, %s532_s7 }
  0x61   : > { %v392_v0 = vsel %vm318_vm3, %v383_v60, 0.0  ;;  %p808_p9 = scmp.ne.s32.totalorder %s532_s7, %s807_s9  ;;  %p815_p12 = scmp.lt.s32.totalorder %s807_s9, %s807_s9 }
  0x62   : > { %v393_v4 = vrot.slane %v392_v0, 4  ;;  %v387_v7 = vadd.f32 %v386_v3, %v385_v63 }
  0x63   : > { %p809_p11 = pnand %p808_p9, %p1066_p7  ;;  %p816_p0 = por %p815_p12, %p814_p8 }
  0x64   : > { %v394_v8 = vadd.f32 %v393_v4, %v392_v0  ;;  %v388_v9 = vrot.slane %v387_v7, 2  ;;  %v469_v4 = vld [vmem:[#allocation5] sm:$0x3] }
  0x65   : > { %p810_p6 = pneg %p809_p11 }
  0x66   : > { %v395_v10 = vrot.slane %v394_v8, 2  ;;  %v389_v11 = vadd.f32 %v388_v9, %v387_v7 }
  0x67   : > { %p817_p2 = pnand %p816_p0, %p810_p6 }
  0x68   : > { %v396_v12 = vadd.f32 %v395_v10, %v394_v8  ;;  %v390_v13 = vrot.slane %v389_v11, 1 }
  0x69   : > { %v738_v49 = vpop.eup %737 }
  0x6a   : > { %v341_v50 = vcombine.high %v738_v49, %v738_v49  ;;  %v343_v51 = vsel %vm318_vm3, %v738_v49, 0.0  ;;  %v397_v15 = vrot.slane %v396_v12, 1  ;;  %v391_v19 = vadd.f32 %v390_v13, %v389_v11 }
  0x6b   : > { %v344_v53 = vrot.slane %v343_v51, 4 }
  0x6c   : > { %v350_v52 = vsel %vm318_vm3, %v341_v50, 0.0  ;;  %v398_v22 = vadd.f32 %v397_v15, %v396_v12 }
  0x6d   : > { %v351_v54 = vrot.slane %v350_v52, 4  ;;  %v345_v55 = vadd.f32 %v344_v53, %v343_v51 }
  0x6f   : > { %v352_v56 = vadd.f32 %v351_v54, %v350_v52  ;;  %v346_v58 = vrot.slane %v345_v55, 2 }
  0x71   : > { %v353_v59 = vrot.slane %v352_v56, 2  ;;  %v347_v61 = vadd.f32 %v346_v58, %v345_v55 }
  0x73   : > { %v354_v62 = vadd.f32 %v353_v59, %v352_v56  ;;  %v348_v1 = vrot.slane %v347_v61, 1 }
  0x75   : > { %v355_v2 = vrot.slane %v354_v62, 1  ;;  %v349_v5 = vadd.f32 %v348_v1, %v347_v61 }
  0x77   : > { %v356_v6 = vadd.f32 %v355_v2, %v354_v62  ;;  %739 = vlog2.f32 %v349_v5 }
  0x79   : > { %741 = vlog2.f32 %v356_v6 }
  0x81   : > { %v740_v14 = vpop.eup %739 }
  0x82   : > { %v358_v17 = vmul.f32 0.6931472, %v740_v14 }
  0x83   : > { %v742_v16 = vpop.eup %741 }
  0x84   : > { %v360_v21 = vmul.f32 0.6931472, %v742_v16  ;;  %v421_v25 = vsub.f32 %v391_v19, %v358_v17 }
  0x86   : > { %v422_v26 = vsub.f32 %v398_v22, %v360_v21  ;;  %v423_v27 = vmul.f32 1.442695, %v421_v25 }
  0x88   : > { %v425_v28 = vmul.f32 1.442695, %v422_v26  ;;  %743 = vpow2.f32 %v423_v27 }
  0x8a   : > { %745 = vpow2.f32 %v425_v28 }
  0x92   : > { %v744_v29 = vpop.eup %743 }
  0x93   : > { %v427_v31 = vadd.f32 1e-06, %v744_v29 }
  0x94   : > { %v746_v30 = vpop.eup %745 }
  0x95   : > { %v428_v32 = vadd.f32 1e-06, %v746_v30  ;;  %747 = vlog2.f32 %v427_v31  ;;  %v435_v50 = vsub.f32 1.0, %v427_v31 }
  0x97   : > { %749 = vlog2.f32 %v428_v32  ;;  %v436_v51 = vsub.f32 1.0, %v428_v32  ;;  %v437_v56 = vmul.f32 %v435_v50, %v435_v50 }
  0x99   : > { %v438_v57 = vmul.f32 %v436_v51, %v436_v51 }
  0x9f   : > { %v748_v43 = vpop.eup %747 }
  0xa0   : > { %v430_v53 = vmul.f32 0.6931472, %v748_v43 }
  0xa1   : > { %v750_v47 = vpop.eup %749 }
  0xbe   : > { %v403_v33 = vpop.permute.xlu0 %402 }
  0xbf   : > { %v405_v34 = vmul.f32 %v1044_v23, %v403_v33  ;;  %v406_v36 = vmul.f32 %v1046_v24, %v403_v33  ;;  %v432_v24 = vmul.f32 0.6931472, %v750_v47 }
  0xc1   : > { %v407_v37 = vsel %vm318_vm3, %v405_v34, 0.0  ;;  %v414_v38 = vsel %vm318_vm3, %v406_v36, 0.0 }
  0xc2   : > { %v408_v39 = vrot.slane %v407_v37, 4  ;;  %v415_v40 = vrot.slane %v414_v38, 4 }
  0xc4   : > { %v409_v41 = vadd.f32 %v408_v39, %v407_v37  ;;  %v416_v42 = vadd.f32 %v415_v40, %v414_v38 }
  0xc6   : > { %v410_v44 = vrot.slane %v409_v41, 2  ;;  %v417_v46 = vrot.slane %v416_v42, 2 }
  0xc8   : > { %v411_v48 = vadd.f32 %v410_v44, %v409_v41  ;;  %v418_v49 = vadd.f32 %v417_v46, %v416_v42 }
  0xca   : > { %v412_v52 = vrot.slane %v411_v48, 1  ;;  %v419_v23 = vrot.slane %v418_v49, 1 }
  0xcc   : > { %v413_v54 = vadd.f32 %v412_v52, %v411_v48  ;;  %v420_v55 = vadd.f32 %v419_v23, %v418_v49 }
  0xce   : > { %v433_v58 = vmul.f32 %v430_v53, %v413_v54  ;;  %v434_v59 = vmul.f32 %v432_v24, %v420_v55 }
  0xd0   : > { %v439_v60 = vmul.f32 %v437_v56, %v433_v58  ;;  %v440_v61 = vmul.f32 %v438_v57, %v434_v59 }
  0xd2   : > { %v441_v62 = vsub.f32 0.0, %v439_v60  ;;  %v442_v63 = vsub.f32 0.0, %v440_v61 }
  0xd4   : > { %v470_v0 = vsel %vm465_vm7, %v441_v62, 0.0  ;;  %v471_v1 = vsel %vm466_vm8, %v442_v63, 0.0 }
  0xd5   : > { %v474_v2 = vcombine.low %v470_v0, %v471_v1 }
  0xd7   : > { %v481_v3 = vrot.slane %v474_v2, %v1056_v35 }
  0xd9   : > { %v488_v5 = vrot.slane %v481_v3, %v1056_v35 }
  0xdb   : > { %v490_v6 = vadd.f32 %v488_v5, %v469_v4 }
  0xdd   : > { %495 = vst.msk [vmem:[#allocation5] sm:$0x3] %vm1060_vm9, %v490_v6 }
  0xde   : > { %820 = shalt.err (!%p817_p2)
}
  0xdf   : > { %s821_s26 = scalar_lea.hbm %s1153_s3, 32 }
  0xe0   : > { %p822_p3 = scmp.ne.s32.totalorder %s1153_s3, %s821_s26  ;;  %p827_p5 = scmp.lt.u32.totalorder %s821_s26, %s1153_s3 }
  0xe2   : > { %p823_p4 = pnand %p822_p3, %p1066_p7 }
  0xe4   : > { %p824_p1 = pneg %p823_p4 }
  0xe6   : > { %p829_p13 = pnand %p827_p5, %p824_p1 }
  0xe8   : > { %832 = shalt.err (!%p829_p13)
}
  0xe9   : > { %665 = dma.vmem_to_hbm [thread:$0]  (%p1066_p7), %s532_s7, 32, %s1153_s3, [#allocation4]  }
  0xea   : > { %862 = dma.done.wait (%p1066_p7), [#allocation4], 32  }
  0xeb   : > { %864 = vsyncadd (%p1066_p7), [#allocation4], 4294967264 }
  0xec   : > { %866 = dma.done.wait (%p1066_p7), [#allocation7], 32  }
  0xed   : > { %868 = vsyncadd (%p1066_p7), [#allocation7], 4294967264 }
  0xee PF: > { %s20_s20 = sadd.s32 1, %s891_s20   ;;  %s1163_s15 = smov %s875_s16 }
  0xef   : > { %p17_p10 = scmp.ge.s32.totalorder %s20_s20, 4   ;;  %s1164_s16 = smov %s879_s17 }
  0xf0   : > { %s1165_s17 = smov %s976_s27  ;;  %s1166_s18 = smov %s887_s19 }
  0xf1   : > { %s1167_s19 = smov %s1169_s22  ;;  %19 = sbr.rel (!%p17_p10) target bundleno = 6 (0x6), region = 86 }
  0xf8   :  { %562 = vsyncpa [#allocation3], 1 }
  0xf9   :  { %564 = vsyncpa [#allocation3 + $0x1], 1 }
  0xfa   :  { %565 = vsyncpa [#allocation4], 1 }
  0xfb   :  { %567 = vsyncpa [#allocation4 + $0x1], 1 }
  0xfc   :  { %568 = vsyncpa [#allocation7], 1 }

</bundles_post_ra>
